<compile_context>
chip_gen: v5e
topology: v5e:2x2
jax: 0.10.0
libtpu: 0.0.40
codegen_flags: <defaults>
</compile_context>

<pallas_src>
import jax
import jax.numpy as jnp
from jax.experimental import pallas as pl
from jax.experimental.pallas import tpu as pltpu

# ---- synthetic config (small shapes, stand-ins for c.*) --------------------
FILTERS = 4            # c.filters
BOARD = 8              # c.board_size  -> board^2 = 64 spatial positions
HIDDEN = 32            # c.value_hidden_units
BATCH = 2
BN_EPS = 1e-5

HIDDEN_PAD = 128       # hidden width padded to a full lane tile
OUT_LANES = 128        # lane-dense output slab width


def _round_up(x, m):
    return (x + m - 1) // m * m


def _value_head_kernel(x_ref,    # (TN, HW*C)            activations
                       w1_ref,   # (HW*C, HIDDEN_PAD)    folded conv+BN+linear1
                       b1_ref,   # (1, HIDDEN_PAD)       folded bias
                       w2_ref,   # (HIDDEN_PAD, 128)     linear2 weight, lane-tiled
                       b2_ref,   # (1, 128)              linear2 bias, lane-tiled
                       o_ref):   # (TN, 128)             value broadcast over lanes
    # linear1 (conv + BN already folded in) + ReLU; K = HW*C = 256 on the MXU.
    h = jnp.dot(x_ref[...], w1_ref[...], preferred_element_type=jnp.float32)
    h = jnp.maximum(h + b1_ref[...], 0.0)                       # (TN, 128)
    # linear2 + tanh; w2 is tiled so every output lane carries the scalar
    # value -> full-width unmasked store.
    out = jnp.dot(h, w2_ref[...], preferred_element_type=jnp.float32)
    o_ref[...] = jnp.tanh(out + b2_ref[...])                    # (TN, 128)


def value_head_pallas(x_nchw, params):
    """x_nchw: (N, C, H, W) float32.  Returns (N, 1) float32."""
    n, c, hgt, wdt = x_nchw.shape
    hw = hgt * wdt
    hwc = hw * c

    # ---- glue (f32): fold conv(1x1) + eval-mode BN into linear1 ------------
    gamma, beta, mean, var = (params["bn_gamma"], params["bn_beta"],
                              params["bn_mean"], params["bn_var"])
    bn_scale = gamma / jnp.sqrt(var + BN_EPS)
    bn_shift = beta - mean * bn_scale
    wc = params["conv_w"][:, 0]          # (C,)
    bc = params["conv_b"][0, 0]          # ()

    w1 = params["w1"]                    # (HW, HIDDEN)
    b1 = params["b1"][0]                 # (HIDDEN,)
    w2 = params["w2"]                    # (HIDDEN, 1)
    b2 = params["b2"][0, 0]              # ()

    # W1'[(p,c), j] = bn_scale * wc[c] * w1[p, j]   (row order (p, c) matches
    # the NHWC flatten below and PyTorch's .view(-1, board^2) row order).
    w1_fold = (w1[:, None, :] * (bn_scale * wc)[None, :, None]).reshape(hwc, HIDDEN)
    b1_fold = b1 + (bc * bn_scale + bn_shift) * jnp.sum(w1, axis=0)

    # Pad hidden 32 -> 128 (zero cols stay 0 through ReLU -> no effect).
    w1_pad = jnp.zeros((hwc, HIDDEN_PAD), jnp.float32).at[:, :HIDDEN].set(w1_fold)
    b1_pad = jnp.zeros((1, HIDDEN_PAD), jnp.float32).at[0, :HIDDEN].set(b1_fold)

    # Tile linear2 weight/bias across all 128 output lanes -> lane-dense store.
    w2_pad = jnp.zeros((HIDDEN_PAD, 1), jnp.float32).at[:HIDDEN, :].set(w2)
    w2_tiled = jnp.tile(w2_pad, (1, OUT_LANES))                 # (128, 128)
    b2_tiled = jnp.full((1, OUT_LANES), b2, jnp.float32)

    # ---- activations: NCHW -> NHWC -> (N, HW*C) -----------------------------
    # TODO(synk): upstream residual tower should emit NHWC directly so this
    # standalone transpose (an extra HBM round trip) disappears.
    x2d = jnp.transpose(x_nchw, (0, 2, 3, 1)).reshape(n, hwc)

    # Batch tile: multiple of 8 sublanes; small enough for v7x's 64 MiB VMEM.
    tn = min(_round_up(n, 8), 512)
    n_pad = _round_up(n, tn)
    if n_pad != n:
        x2d = jnp.pad(x2d, ((0, n_pad - n), (0, 0)))

    out = pl.pallas_call(
        _value_head_kernel,
        out_shape=jax.ShapeDtypeStruct((n_pad, OUT_LANES), jnp.float32),
        grid_spec=pltpu.PrefetchScalarGridSpec(
            num_scalar_prefetch=0,
            grid=(n_pad // tn,),
            in_specs=[
                pl.BlockSpec((tn, hwc), lambda i: (i, 0)),          # x tiles
                pl.BlockSpec((hwc, HIDDEN_PAD), lambda i: (0, 0)),  # W1'
                pl.BlockSpec((1, HIDDEN_PAD), lambda i: (0, 0)),    # b1'
                pl.BlockSpec((HIDDEN_PAD, OUT_LANES), lambda i: (0, 0)),  # W2 tiled
                pl.BlockSpec((1, OUT_LANES), lambda i: (0, 0)),     # b2 tiled
            ],
            out_specs=pl.BlockSpec((tn, OUT_LANES), lambda i: (i, 0)),
        ),
        compiler_params=pltpu.CompilerParams(
            dimension_semantics=("parallel",)),
    )(x2d, w1_pad, b1_pad, w2_tiled, b2_tiled)

    # Every lane carries the same value; take column 0, drop batch padding.
    return out[:n, :1]


def value_head_ref(x_nchw, params):
    """Pure-JAX reference mirroring the PyTorch forward (eval-mode BN)."""
    n = x_nchw.shape[0]
    conv = jnp.einsum("nchw,c->nhw", x_nchw, params["conv_w"][:, 0]) \
        + params["conv_b"][0, 0]                                        # (N,H,W)
    scale = params["bn_gamma"] / jnp.sqrt(params["bn_var"] + BN_EPS)
    bn = (conv - params["bn_mean"]) * scale + params["bn_beta"]
    flat = bn.reshape(n, -1)
    h = jnp.maximum(flat @ params["w1"] + params["b1"][0], 0.0)
    return jnp.tanh(h @ params["w2"] + params["b2"][0])


def make_params(key):
    ks = jax.random.split(key, 8)
    hw = BOARD * BOARD
    return {
        "conv_w": jax.random.normal(ks[0], (FILTERS, 1), jnp.float32) * 0.2,
        "conv_b": jax.random.normal(ks[1], (1, 1), jnp.float32) * 0.1,
        "bn_gamma": jnp.float32(1.1),
        "bn_beta": jnp.float32(0.05),
        "bn_mean": jnp.float32(0.02),
        "bn_var": jnp.float32(0.9),
        "w1": jax.random.normal(ks[2], (hw, HIDDEN), jnp.float32) * 0.1,
        "b1": jax.random.normal(ks[3], (1, HIDDEN), jnp.float32) * 0.1,
        "w2": jax.random.normal(ks[4], (HIDDEN, 1), jnp.float32) * 0.1,
        "b2": jax.random.normal(ks[5], (1, 1), jnp.float32) * 0.1,
    }


if __name__ == "__main__":
    key = jax.random.PRNGKey(0)
    kx, kp = jax.random.split(key)
    x = jax.random.normal(kx, (BATCH, FILTERS, BOARD, BOARD), jnp.float32)
    params = make_params(kp)

    out = value_head_pallas(x, params)
    out = jax.block_until_ready(out)

    ref = value_head_ref(x, params)
    assert out.shape == (BATCH, 1), out.shape
    assert jnp.allclose(out, ref, atol=5e-5, rtol=5e-5), (out, ref)

    print("KERNEL_OK")
</pallas_src>

<mosaic_0001>
module attributes {stable_mosaic.version = 11 : i64} {
  func.func @_value_head_kernel(%arg0: i32, %arg1: memref<8x256xf32, #tpu.memory_space<vmem>>, %arg2: memref<256x128xf32, #tpu.memory_space<vmem>>, %arg3: memref<1x128xf32, #tpu.memory_space<vmem>>, %arg4: memref<128x128xf32, #tpu.memory_space<vmem>>, %arg5: memref<1x128xf32, #tpu.memory_space<vmem>>, %arg6: memref<8x128xf32, #tpu.memory_space<vmem>>) attributes {dimension_semantics = [#tpu.dimension_semantics<parallel>], iteration_bounds = array<i64: 1>, scalar_prefetch = 0 : i64, scratch_operands = 0 : i64, tpu.core_type = #tpu.core_type<tc>, window_params = [{transform_indices = @transform_0, window_bounds = array<i64: 8, 256>}, {pipeline_mode = #tpu.pipeline_mode<synchronous>, transform_indices = @transform_1, window_bounds = array<i64: 256, 128>}, {pipeline_mode = #tpu.pipeline_mode<synchronous>, transform_indices = @transform_2, window_bounds = array<i64: 1, 128>}, {pipeline_mode = #tpu.pipeline_mode<synchronous>, transform_indices = @transform_3, window_bounds = array<i64: 128, 128>}, {pipeline_mode = #tpu.pipeline_mode<synchronous>, transform_indices = @transform_4, window_bounds = array<i64: 1, 128>}, {transform_indices = @transform_5, window_bounds = array<i64: 8, 128>}]} {
    %c0 = arith.constant 0 : index
    %c0_0 = arith.constant 0 : index
    %0 = vector.load %arg1[%c0, %c0_0] : memref<8x256xf32, #tpu.memory_space<vmem>>, vector<8x256xf32>
    %c0_1 = arith.constant 0 : index
    %c0_2 = arith.constant 0 : index
    %1 = vector.load %arg2[%c0_1, %c0_2] : memref<256x128xf32, #tpu.memory_space<vmem>>, vector<256x128xf32>
    %cst = arith.constant dense<0.000000e+00> : vector<8x128xf32>
    %2 = tpu.matmul %0, %1, %cst {dimension_numbers = #tpu.dot_dimension_numbers<[1], [0], [0], [1], [0, 0, 1, 1], [], []>} : vector<8x256xf32>, vector<256x128xf32>, vector<8x128xf32> -> vector<8x128xf32>
    %c0_3 = arith.constant 0 : index
    %c0_4 = arith.constant 0 : index
    %3 = vector.load %arg3[%c0_3, %c0_4] : memref<1x128xf32, #tpu.memory_space<vmem>>, vector<1x128xf32>
    %4 = vector.broadcast %3 : vector<1x128xf32> to vector<8x128xf32>
    %5 = arith.addf %2, %4 : vector<8x128xf32>
    %cst_5 = arith.constant 0.000000e+00 : f32
    %6 = vector.broadcast %cst_5 : f32 to vector<8x128xf32>
    %7 = arith.maximumf %5, %6 : vector<8x128xf32>
    %c0_6 = arith.constant 0 : index
    %c0_7 = arith.constant 0 : index
    %8 = vector.load %arg4[%c0_6, %c0_7] : memref<128x128xf32, #tpu.memory_space<vmem>>, vector<128x128xf32>
    %cst_8 = arith.constant dense<0.000000e+00> : vector<8x128xf32>
    %9 = tpu.matmul %7, %8, %cst_8 {dimension_numbers = #tpu.dot_dimension_numbers<[1], [0], [0], [1], [0, 0, 1, 1], [], []>} : vector<8x128xf32>, vector<128x128xf32>, vector<8x128xf32> -> vector<8x128xf32>
    %c0_9 = arith.constant 0 : index
    %c0_10 = arith.constant 0 : index
    %10 = vector.load %arg5[%c0_9, %c0_10] : memref<1x128xf32, #tpu.memory_space<vmem>>, vector<1x128xf32>
    %11 = vector.broadcast %10 : vector<1x128xf32> to vector<8x128xf32>
    %12 = arith.addf %9, %11 : vector<8x128xf32>
    %13 = math.tanh %12 : vector<8x128xf32>
    %c0_11 = arith.constant 0 : index
    %c0_12 = arith.constant 0 : index
    %14 = vector.load %arg6[%c0_11, %c0_12] : memref<8x128xf32, #tpu.memory_space<vmem>>, vector<8x128xf32>
    tpu.vector_store %arg6[%c0_11, %c0_12], %13 {strides = array<i32>} : memref<8x128xf32, #tpu.memory_space<vmem>>, vector<8x128xf32>,
    return
  }
  func.func @transform_0(%arg0: i32) -> (i32, i32) {
    %c0_i32 = arith.constant 0 : i32
    %c0_i32_0 = arith.constant 0 : i32
    return %arg0, %c0_i32 : i32, i32
  }
  func.func @transform_1(%arg0: i32) -> (i32, i32) {
    %c0_i32 = arith.constant 0 : i32
    %c0_i32_0 = arith.constant 0 : i32
    %c0_i32_1 = arith.constant 0 : i32
    return %c0_i32, %c0_i32_0 : i32, i32
  }
  func.func @transform_2(%arg0: i32) -> (i32, i32) {
    %c0_i32 = arith.constant 0 : i32
    %c0_i32_0 = arith.constant 0 : i32
    %c0_i32_1 = arith.constant 0 : i32
    return %c0_i32, %c0_i32_0 : i32, i32
  }
  func.func @transform_3(%arg0: i32) -> (i32, i32) {
    %c0_i32 = arith.constant 0 : i32
    %c0_i32_0 = arith.constant 0 : i32
    %c0_i32_1 = arith.constant 0 : i32
    return %c0_i32, %c0_i32_0 : i32, i32
  }
  func.func @transform_4(%arg0: i32) -> (i32, i32) {
    %c0_i32 = arith.constant 0 : i32
    %c0_i32_0 = arith.constant 0 : i32
    %c0_i32_1 = arith.constant 0 : i32
    return %c0_i32, %c0_i32_0 : i32, i32
  }
  func.func @transform_5(%arg0: i32) -> (i32, i32) {
    %c0_i32 = arith.constant 0 : i32
    %c0_i32_0 = arith.constant 0 : i32
    return %arg0, %c0_i32 : i32, i32
  }
}

</mosaic_0001>

<bundles_post_ra>
// kernel: tpu_custom_call.1
= control target key start
LH: loop header
LB: loop body
LE: loop exit
PB: predicated region body
PF: predicated region fallthrough
CT: control target
= control target key end

     0   :  { %10 = vsyncpa [#allocation3], 0  ;;  %s371_s0 = inlined_call_operand.hbm [shape: f32[8,256], index: 0, kind: input, shape index: {}]   ;;  %s372_s1 = inlined_call_operand.hbm [shape: f32[256,128], index: 1, kind: input, shape index: {}]   ;;  %s373_s2 = inlined_call_operand.vmem [shape: f32[1,128], index: 2, kind: input, shape index: {}]   ;;  %s374_s3 = inlined_call_operand.hbm [shape: f32[128,128], index: 3, kind: input, shape index: {}]   ;;  %s375_s4 = inlined_call_operand.vmem [shape: f32[1,128], index: 4, kind: input, shape index: {}]   ;;  %s376_s5 = inlined_call_operand.hbm [shape: f32[8,128], index: 5, kind: output, shape index: {}]  }
   0x1   :  { %11 = vsyncpa [#allocation6], 0  ;;  %s28_s20 = sshll.u32 %s372_s1, 4  ;;  %s29_s20 = int_to_ptr.hbm [resolvable:$true] %s28_s20 }
   0x2   :  { %12 = vsyncpa [#allocation4], 0  ;;  %s317_s21 = smov [#allocation5]   ;;  %s18_s25 = sshll.u32 %s371_s0, 4  ;;  %s19_s25 = int_to_ptr.hbm [resolvable:$true] %s18_s25 }
   0x3   :  { %s30_s22 = sshll.u32 %s317_s21, 4  ;;  %s318_s26 = smov 128   ;;  %s31_s22 = int_to_ptr.vmem [resolvable:$true] %s30_s22 }
   0x4   :  { %s319_s27 = smov 8   ;;  %s320_s28 = smov [#allocation2]  }
   0x5   :  { %36 = dma.hbm_to_vmem [thread:$0]  %s29_s20, 4096, %s31_s22, [#allocation6], %s318_s26, %s318_s26, %s319_s27  }
   0x6   :  { %s20_s29 = sshll.u32 %s320_s28, 4  ;;  %s43_s7 = sshll.u32 %s374_s3, 4  ;;  %s21_s29 = int_to_ptr.vmem [resolvable:$true] %s20_s29  ;;  %s44_s7 = int_to_ptr.hbm [resolvable:$true] %s43_s7 }
   0x7   :  { %23 = dma.hbm_to_vmem [thread:$0]  %s19_s25, 256, %s21_s29, [#allocation3]  }
   0x8   :  { %s321_s1 = smov [#allocation7]  }
   0x9   :  { %s45_s8 = sshll.u32 %s321_s1, 4  ;;  %s46_s8 = int_to_ptr.vmem [resolvable:$true] %s45_s8 }
   0xa   :  { %51 = dma.hbm_to_vmem [thread:$0]  %s44_s7, 2048, %s46_s8, [#allocation6], %s318_s26, %s318_s26, %s319_s27  }
   0xb   :  { %311 = dma.done.wait [#allocation3], 256  }
   0xc   :  { %312 = vsyncadd [#allocation3], 4294967040 }
   0xd   :  { %313 = dma.done.wait [#allocation6], 6144  }
   0xe   :  { %314 = vsyncadd [#allocation6], 4294961152  ;;  %v83_v0 = vld [vmem:[#allocation5 + $0x78] sm:$0xff]  ;;  %v82_v1 = vld [vmem:[#allocation5 + $0x70] sm:$0xff]  ;;  %s322_s11 = smov [#allocation8]   ;;  %s194_s15 = sshll.u32 %s376_s5, 4  ;;  %s195_s15 = int_to_ptr.hbm [resolvable:$true] %s194_s15 }
   0xf   :  { %v99_v2 = vld [vmem:[#allocation5 + $0xf8] sm:$0xff]  ;;  %104 = vmatpush.msra.mxu0 %v83_v0  ;;  %v98_v3 = vld [vmem:[#allocation5 + $0xf0] sm:$0xff]  ;;  %v81_v4 = vld [vmem:[#allocation5 + $0x68] sm:$0xff]  ;;  %s192_s12 = sshll.u32 %s322_s11, 4  ;;  %s193_s12 = int_to_ptr.vmem [resolvable:$true] %s192_s12 }
  0x10   :  { %124 = vmatpush.msra.mxu1 %v99_v2  ;;  %v97_v5 = vld [vmem:[#allocation5 + $0xe8] sm:$0xff]  ;;  %v80_v6 = vld [vmem:[#allocation5 + $0x60] sm:$0xff]  ;;  %v79_v8 = vld [vmem:[#allocation5 + $0x58] sm:$0xff] }
  0x11   :  { %105 = vmatpush.msra.mxu0 %v82_v1  ;;  %v96_v7 = vld [vmem:[#allocation5 + $0xe0] sm:$0xff]  ;;  %v95_v9 = vld [vmem:[#allocation5 + $0xd8] sm:$0xff]  ;;  %v78_v10 = vld [vmem:[#allocation5 + $0x50] sm:$0xff] }
  0x12   :  { %125 = vmatpush.msra.mxu1 %v98_v3  ;;  %v94_v11 = vld [vmem:[#allocation5 + $0xd0] sm:$0xff]  ;;  %v77_v12 = vld [vmem:[#allocation5 + $0x48] sm:$0xff]  ;;  %v160_v14 = vld [vmem:[#allocation7 + $0x78] sm:$0xff] }
  0x13   :  { %106 = vmatpush.msra.mxu0 %v81_v4  ;;  %v93_v13 = vld [vmem:[#allocation5 + $0xc8] sm:$0xff]  ;;  %v159_v15 = vld [vmem:[#allocation7 + $0x70] sm:$0xff]  ;;  %v76_v16 = vld [vmem:[#allocation5 + $0x40] sm:$0xff]  ;;  %165 = vmatpush.msra.mxu2 %v160_v14 }
  0x14   :  { %126 = vmatpush.msra.mxu1 %v97_v5  ;;  %v92_v17 = vld [vmem:[#allocation5 + $0xc0] sm:$0xff]  ;;  %v158_v18 = vld [vmem:[#allocation7 + $0x68] sm:$0xff]  ;;  %v75_v19 = vld [vmem:[#allocation5 + $0x38] sm:$0xff] }
  0x15   :  { %107 = vmatpush.msra.mxu0 %v80_v6  ;;  %v91_v20 = vld [vmem:[#allocation5 + $0xb8] sm:$0xff]  ;;  %166 = vmatpush.msra.mxu2 %v159_v15  ;;  %v157_v21 = vld [vmem:[#allocation7 + $0x60] sm:$0xff]  ;;  %v74_v22 = vld [vmem:[#allocation5 + $0x30] sm:$0xff] }
  0x16   :  { %127 = vmatpush.msra.mxu1 %v96_v7  ;;  %v90_v23 = vld [vmem:[#allocation5 + $0xb0] sm:$0xff]  ;;  %v156_v24 = vld [vmem:[#allocation7 + $0x58] sm:$0xff]  ;;  %v73_v25 = vld [vmem:[#allocation5 + $0x28] sm:$0xff] }
  0x17   :  { %108 = vmatpush.msra.mxu0 %v79_v8  ;;  %167 = vmatpush.msra.mxu2 %v158_v18  ;;  %v89_v26 = vld [vmem:[#allocation5 + $0xa8] sm:$0xff]  ;;  %v155_v27 = vld [vmem:[#allocation7 + $0x50] sm:$0xff]  ;;  %v72_v28 = vld [vmem:[#allocation5 + $0x20] sm:$0xff] }
  0x18   :  { %128 = vmatpush.msra.mxu1 %v95_v9  ;;  %v88_v29 = vld [vmem:[#allocation5 + $0xa0] sm:$0xff]  ;;  %v154_v30 = vld [vmem:[#allocation7 + $0x48] sm:$0xff]  ;;  %v71_v31 = vld [vmem:[#allocation5 + $0x18] sm:$0xff] }
  0x19   :  { %109 = vmatpush.msra.mxu0 %v78_v10  ;;  %168 = vmatpush.msra.mxu2 %v157_v21  ;;  %v87_v32 = vld [vmem:[#allocation5 + $0x98] sm:$0xff]  ;;  %v153_v33 = vld [vmem:[#allocation7 + $0x40] sm:$0xff]  ;;  %v70_v34 = vld [vmem:[#allocation5 + $0x10] sm:$0xff] }
  0x1a   :  { %129 = vmatpush.msra.mxu1 %v94_v11  ;;  %v86_v35 = vld [vmem:[#allocation5 + $0x90] sm:$0xff]  ;;  %v152_v36 = vld [vmem:[#allocation7 + $0x38] sm:$0xff]  ;;  %v69_v37 = vld [vmem:[#allocation5 + $0x8] sm:$0xff] }
  0x1b   :  { %110 = vmatpush.msra.mxu0 %v77_v12  ;;  %169 = vmatpush.msra.mxu2 %v156_v24  ;;  %v85_v38 = vld [vmem:[#allocation5 + $0x88] sm:$0xff]  ;;  %v151_v39 = vld [vmem:[#allocation7 + $0x30] sm:$0xff]  ;;  %v68_v40 = vld [vmem:[#allocation5] sm:$0xff] }
  0x1c   :  { %130 = vmatpush.msra.mxu1 %v93_v13  ;;  %v84_v41 = vld [vmem:[#allocation5 + $0x80] sm:$0xff]  ;;  %v66_v42 = vld [vmem:[#allocation2] sm:$0xff]  ;;  %v67_v43 = vld [vmem:[#allocation2 + $0x8] sm:$0xff] }
  0x1d   :  { %111 = vmatpush.msra.mxu0 %v76_v16  ;;  %170 = vmatpush.msra.mxu2 %v155_v27  ;;  %v150_v44 = vld [vmem:[#allocation7 + $0x28] sm:$0xff]  ;;  %v149_v45 = vld [vmem:[#allocation7 + $0x20] sm:$0xff]  ;;  %v148_v46 = vld [vmem:[#allocation7 + $0x18] sm:$0xff] }
  0x1e   :  { %131 = vmatpush.msra.mxu1 %v92_v17  ;;  %v147_v47 = vld [vmem:[#allocation7 + $0x10] sm:$0xff]  ;;  %v146_v48 = vld [vmem:[#allocation7 + $0x8] sm:$0xff]  ;;  %v145_v49 = vld [vmem:[#allocation7] sm:$0xff] }
  0x1f   :  { %112 = vmatpush.msra.mxu0 %v75_v19  ;;  %171 = vmatpush.msra.mxu2 %v154_v30  ;;  %v211_v50 = vld [vmem:[%s373_s2] ss:$0 sm:$0xff] }
  0x20   :  { %132 = vmatpush.msra.mxu1 %v91_v20  ;;  %v212_v56 = vld [vmem:[%s375_s4] ss:$0 sm:$0xff] }
  0x21   :  { %113 = vmatpush.msra.mxu0 %v74_v22  ;;  %172 = vmatpush.msra.mxu2 %v153_v33 }
  0x22   :  { %133 = vmatpush.msra.mxu1 %v90_v23 }
  0x23   :  { %114 = vmatpush.msra.mxu0 %v73_v25  ;;  %173 = vmatpush.msra.mxu2 %v152_v36 }
  0x24   :  { %134 = vmatpush.msra.mxu1 %v89_v26 }
  0x25   :  { %115 = vmatpush.msra.mxu0 %v72_v28  ;;  %174 = vmatpush.msra.mxu2 %v151_v39 }
  0x26   :  { %135 = vmatpush.msra.mxu1 %v88_v29 }
  0x27   :  { %116 = vmatpush.msra.mxu0 %v71_v31  ;;  %175 = vmatpush.msra.mxu2 %v150_v44 }
  0x28   :  { %136 = vmatpush.msra.mxu1 %v87_v32 }
  0x29   :  { %117 = vmatpush.msra.mxu0 %v70_v34  ;;  %176 = vmatpush.msra.mxu2 %v149_v45 }
  0x2a   :  { %137 = vmatpush.msra.mxu1 %v86_v35 }
  0x2b   :  { %118 = vmatpush.msra.mxu0 %v69_v37  ;;  %177 = vmatpush.msra.mxu2 %v148_v46 }
  0x2c   :  { %138 = vmatpush.msra.mxu1 %v85_v38 }
  0x2d   :  { %119 = vmatpush.msra.mxu0 %v68_v40  ;;  %178 = vmatpush.msra.mxu2 %v147_v47 }
  0x2e   :  { %139 = vmatpush.msra.mxu1 %v84_v41  ;;  %120 = vmatmul.f32.vlgmr.msra.gmra.mxu0 %v66_v42 }
  0x2f   :  { %140 = vmatmul.f32.vlgmr.msra.gmra.mxu1 %v67_v43  ;;  %179 = vmatpush.msra.mxu2 %v146_v48 }
  0x31   :  { %180 = vmatpush.msra.mxu2 %v145_v49 }
  0xab   :  { %v121_v51 = vpop.f32.mrf.mxu0 }
  0xac   :  { %v141_v52 = vpop.f32.mrf.mxu1  ;;  %v122_v53 = vadd.f32 %v211_v50, %v121_v51 }
  0xae   :  { %v142_v54 = vadd.f32 %v141_v52, %v122_v53 }
  0xb0   :  { %v144_v55 = vmax.f32 %v142_v54, 0.0 }
  0xb2   :  { %181 = vmatmul.f32.vlgmr.msra.gmra.mxu2 %v144_v55 }
 0x135   :  { %v182_v57 = vpop.f32.mrf.mxu2 }
 0x136   :  { %v183_v58 = vadd.f32 %v212_v56, %v182_v57 }
 0x138   :  { %213 = vtanh.f32 %v183_v58 }
 0x13e   :  { %v214_v59 = vpop.eup %213 }
 0x13f   :  { %186 = vst [vmem:[#allocation8] sm:$0xff] %v214_v59 }
 0x140   :  { %197 = dma.vmem_to_hbm [thread:$0]  %s193_s12, 128, %s195_s15, [#allocation4]  }
 0x141   :  { %315 = dma.done.wait [#allocation4], 128  }
 0x142   :  { %316 = vsyncadd [#allocation4], 4294967168 }
 0x143   :  { %202 = vsyncpa [#allocation3], 1 }
 0x144   :  { %203 = vsyncpa [#allocation6], 1 }
 0x145   :  { %204 = vsyncpa [#allocation4], 1 }

</bundles_post_ra>
